<compile_context>
chip_gen: v7x
topology: tpu7x:2x2x1
jax: 0.10.0
libtpu: 0.0.40
codegen_flags: <defaults>
</compile_context>

<pallas_src>
import math
import functools

import jax
import jax.numpy as jnp
from jax import lax
from jax.experimental import pallas as pl
from jax.experimental.pallas import tpu as pltpu


def _mha_kernel(valid_ref,                     # scalar-prefetch: (B,) int32 in SMEM
                q_ref, k_ref, v_ref,           # (Bt, T, Din) bf16 VMEM tiles
                wq_ref, wk_ref, wv_ref,        # (Din, D) bf16 (constant across grid)
                wo_ref,                        # (D, Dout) bf16, Dout lane-padded
                o_ref,                         # (Bt, Tq, Dout) output tile
                *, num_heads, head_dim, block_b):
    H, dh, Bt = num_heads, head_dim, block_b
    D = H * dh
    Tq = q_ref.shape[1]
    Tk = k_ref.shape[1]
    g = pl.program_id(0)

    f32 = jnp.float32
    bf16 = jnp.bfloat16

    # ---- Dense, lane-wide input projections: one MXU matmul each, N = D. ----
    # Leading-dim merges only; bf16 operands with f32 accumulation; cast straight
    # back to bf16 so no f32 (Bt*T, D) copies stay live through the softmax.
    q2 = q_ref[...].reshape(Bt * Tq, q_ref.shape[2])
    k2 = k_ref[...].reshape(Bt * Tk, k_ref.shape[2])
    v2 = v_ref[...].reshape(Bt * Tk, v_ref.shape[2])
    qp = jnp.dot(q2, wq_ref[...], preferred_element_type=f32).astype(bf16)  # W_q pre-scaled by 1/sqrt(dh)
    kp = jnp.dot(k2, wk_ref[...], preferred_element_type=f32).astype(bf16)
    vp = jnp.dot(v2, wv_ref[...], preferred_element_type=f32).astype(bf16)

    # ---- Head split only for the scores / ctx contractions (transpose_qkv). ----
    # Static lane slices + major-dim stack + leading-dim reshape (no lane-splitting
    # reshape of the value itself).
    def split_heads(x2, T):                    # (Bt*T, D) -> (Bt*H, T, dh), batch-major
        x3 = x2.reshape(Bt, T, D)
        heads = [x3[:, :, h * dh:(h + 1) * dh] for h in range(H)]
        return jnp.stack(heads, axis=1).reshape(Bt * H, T, dh)

    qh = split_heads(qp, Tq)
    kh = split_heads(kp, Tk)
    vh = split_heads(vp, Tk)

    # ---- Scores: one (Bt*H)-batched contraction over dh (no explicit K^T). ----
    scores = jnp.einsum('bqd,bkd->bqk', qh, kh, preferred_element_type=f32)  # (Bt*H, Tq, Tk)

    # ---- masked_softmax mask: key index >= valid_len -> -1e6 (d2l semantics). ----
    s4 = scores.reshape(Bt, H, Tq, Tk)
    bidx = lax.broadcasted_iota(jnp.int32, (Bt, H, Tq, Tk), 0)
    col = lax.broadcasted_iota(jnp.int32, (Bt, H, Tq, Tk), 3)
    for i in range(Bt):                        # static, small; scalar SMEM reads
        vl_i = valid_ref[g * Bt + i]
        s4 = jnp.where((bidx == i) & (col >= vl_i), jnp.float32(-1.0e6), s4)
    scores = s4.reshape(Bt * H, Tq, Tk)

    # ---- Softmax in f32; normalization divide via EUP approx reciprocal. ----
    m = jnp.max(scores, axis=-1, keepdims=True)
    p = jnp.exp(scores - m)
    attn = p * pl.reciprocal(jnp.sum(p, axis=-1, keepdims=True), approx=True)

    # ---- attn @ V, (Bt*H)-batched. ----
    ctx = jnp.einsum('bqk,bkd->bqd', attn.astype(bf16), vh,
                     preferred_element_type=f32).astype(bf16)                # (Bt*H, Tq, dh)

    # ---- transpose_output + dense output projection: one matmul with K = H*dh = D. ----
    ctx4 = ctx.reshape(Bt, H, Tq, dh)
    ctx_cat = jnp.concatenate([ctx4[:, h] for h in range(H)], axis=-1)       # (Bt, Tq, D)
    out = jnp.dot(ctx_cat.reshape(Bt * Tq, D), wo_ref[...],
                  preferred_element_type=f32)                                # (Bt*Tq, Dout)
    o_ref[...] = out.reshape(Bt, Tq, wo_ref.shape[1]).astype(o_ref.dtype)


def _vmem_limit_bytes():
    """Generation-aware VMEM budget (v4/v5e/v6e: 128 MiB physical; v7x: 64 MiB)."""
    try:
        kind = jax.devices()[0].device_kind.lower()
    except Exception:
        return 32 * 1024 * 1024
    if any(t in kind for t in ("v4", "v5", "v6")):
        return 64 * 1024 * 1024
    return 32 * 1024 * 1024


def multi_head_attention(queries, keys, values, valid_lens, wq, wk, wv, wo,
                         *, num_heads, block_b=None, out_dtype=None):
    B, Tq, Dq = queries.shape
    _, Tk, Dk = keys.shape
    Dv = values.shape[-1]
    D = wq.shape[1]
    assert D % num_heads == 0
    dh = D // num_heads
    Dout = wo.shape[1]

    if out_dtype is None:
        out_dtype = queries.dtype   # keep module semantics; pass jnp.bfloat16 to halve writeback

    if valid_lens is None:
        valid_lens = jnp.full((B,), Tk, dtype=jnp.int32)
    valid_lens = valid_lens.astype(jnp.int32)

    # Batch blocking: amortize per-grid-step overhead and raise matmul M for short seqs.
    if block_b is None:
        block_b = min(B, 8)
    while B % block_b:
        block_b -= 1

    # Lane-dense output store: pad output feature dim to a multiple of 128.
    Dout_p = ((Dout + 127) // 128) * 128

    bf16 = jnp.bfloat16
    q_b = queries.astype(bf16)
    k_b = keys.astype(bf16)
    v_b = values.astype(bf16)

    # Weight prep (plain XLA, one-time): fold 1/sqrt(dh) into W_q in f32, then bf16.
    wq_s = (wq * jnp.float32(1.0 / math.sqrt(dh))).astype(bf16)
    wk_b = wk.astype(bf16)
    wv_b = wv.astype(bf16)
    wo_p = wo if Dout_p == Dout else jnp.pad(wo, ((0, 0), (0, Dout_p - Dout)))
    wo_b = wo_p.astype(bf16)

    kernel = functools.partial(_mha_kernel, num_heads=num_heads, head_dim=dh,
                               block_b=block_b)

    grid_spec = pltpu.PrefetchScalarGridSpec(
        num_scalar_prefetch=1,
        grid=(B // block_b,),
        in_specs=[
            pl.BlockSpec((block_b, Tq, Dq), lambda g, vl: (g, 0, 0)),
            pl.BlockSpec((block_b, Tk, Dk), lambda g, vl: (g, 0, 0)),
            pl.BlockSpec((block_b, Tk, Dv), lambda g, vl: (g, 0, 0)),
            pl.BlockSpec((Dq, D), lambda g, vl: (0, 0)),
            pl.BlockSpec((Dk, D), lambda g, vl: (0, 0)),
            pl.BlockSpec((Dv, D), lambda g, vl: (0, 0)),
            pl.BlockSpec((D, Dout_p), lambda g, vl: (0, 0)),
        ],
        out_specs=pl.BlockSpec((block_b, Tq, Dout_p), lambda g, vl: (g, 0, 0)),
    )

    out = pl.pallas_call(
        kernel,
        grid_spec=grid_spec,
        out_shape=jax.ShapeDtypeStruct((B, Tq, Dout_p), out_dtype),
        compiler_params=pltpu.CompilerParams(
            dimension_semantics=("parallel",),
            vmem_limit_bytes=_vmem_limit_bytes(),
        ),
    )(valid_lens, q_b, k_b, v_b, wq_s, wk_b, wv_b, wo_b)

    return out[..., :Dout]


def _reference_mha(queries, keys, values, valid_lens, wq, wk, wv, wo, *, num_heads):
    """Pure-JAX f32 reference mirroring the PyTorch module exactly."""
    def transpose_qkv(X):
        B, T, _ = X.shape
        X = X.reshape(B, T, num_heads, -1).transpose(0, 2, 1, 3)
        return X.reshape(-1, T, X.shape[-1])

    Q = transpose_qkv(queries @ wq)
    K = transpose_qkv(keys @ wk)
    V = transpose_qkv(values @ wv)
    vl = jnp.repeat(valid_lens, num_heads, axis=0)                 # (B*H,)

    d = Q.shape[-1]
    scores = jnp.einsum('bqd,bkd->bqk', Q, K) / math.sqrt(d)       # (B*H, Tq, Tk)
    col = jnp.arange(scores.shape[-1])[None, None, :]
    scores = jnp.where(col < vl[:, None, None], scores, -1.0e6)
    attn = jax.nn.softmax(scores, axis=-1)
    out = jnp.einsum('bqk,bkd->bqd', attn, V)                      # (B*H, Tq, dh)

    BH, Tq, dh = out.shape
    B = BH // num_heads
    out = out.reshape(B, num_heads, Tq, dh).transpose(0, 2, 1, 3).reshape(B, Tq, -1)
    return out @ wo


if __name__ == "__main__":
    # Small shapes consistent with the module.
    B, Tq, Tk = 2, 8, 8
    num_hiddens, num_heads = 32, 4
    q_in = k_in = v_in = 32   # LazyLinear infers input dim; fixed here

    key = jax.random.PRNGKey(0)
    kq, kk, kv, kwq, kwk, kwv, kwo = jax.random.split(key, 7)

    queries = jax.random.normal(kq, (B, Tq, q_in), dtype=jnp.float32)
    keys_   = jax.random.normal(kk, (B, Tk, k_in), dtype=jnp.float32)
    values  = jax.random.normal(kv, (B, Tk, v_in), dtype=jnp.float32)
    valid_lens = jnp.array([3, 6], dtype=jnp.int32)

    # Deterministic Linear(bias=False)-style init, stored as (in, out).
    def init_w(k, fan_in, fan_out):
        bound = 1.0 / math.sqrt(fan_in)
        return jax.random.uniform(k, (fan_in, fan_out), jnp.float32, -bound, bound)

    wq = init_w(kwq, q_in, num_hiddens)
    wk = init_w(kwk, k_in, num_hiddens)
    wv = init_w(kwv, v_in, num_hiddens)
    wo = init_w(kwo, num_hiddens, num_hiddens)

    out = multi_head_attention(queries, keys_, values, valid_lens,
                               wq, wk, wv, wo, num_heads=num_heads)
    out = jax.block_until_ready(out)

    ref = _reference_mha(queries, keys_, values, valid_lens,
                         wq, wk, wv, wo, num_heads=num_heads)
    assert out.shape == (B, Tq, num_hiddens)
    # Kernel uses bf16 MXU operands (f32 accumulation) + approx reciprocal, so compare
    # against the exact f32 reference with a bf16-level tolerance.
    assert jnp.allclose(out, ref, atol=7.5e-2, rtol=7.5e-2), "mismatch vs reference"

    print("KERNEL_OK")
</pallas_src>

<mosaic_0001>
module attributes {stable_mosaic.version = 11 : i64} {
  func.func @_mha_kernel(%arg0: i32, %arg1: memref<2xi32, #tpu.memory_space<smem>>, %arg2: memref<2x8x32xbf16, #tpu.memory_space<vmem>>, %arg3: memref<2x8x32xbf16, #tpu.memory_space<vmem>>, %arg4: memref<2x8x32xbf16, #tpu.memory_space<vmem>>, %arg5: memref<32x32xbf16, #tpu.memory_space<vmem>>, %arg6: memref<32x32xbf16, #tpu.memory_space<vmem>>, %arg7: memref<32x32xbf16, #tpu.memory_space<vmem>>, %arg8: memref<32x128xbf16, #tpu.memory_space<vmem>>, %arg9: memref<2x8x128xf32, #tpu.memory_space<vmem>>) attributes {dimension_semantics = [#tpu.dimension_semantics<parallel>], iteration_bounds = array<i64: 1>, scalar_prefetch = 1 : i64, scratch_operands = 0 : i64, tpu.core_type = #tpu.core_type<tc>, window_params = [{transform_indices = @transform_0, window_bounds = array<i64: 2, 8, 32>}, {transform_indices = @transform_1, window_bounds = array<i64: 2, 8, 32>}, {transform_indices = @transform_2, window_bounds = array<i64: 2, 8, 32>}, {pipeline_mode = #tpu.pipeline_mode<synchronous>, transform_indices = @transform_3, window_bounds = array<i64: 32, 32>}, {pipeline_mode = #tpu.pipeline_mode<synchronous>, transform_indices = @transform_4, window_bounds = array<i64: 32, 32>}, {pipeline_mode = #tpu.pipeline_mode<synchronous>, transform_indices = @transform_5, window_bounds = array<i64: 32, 32>}, {pipeline_mode = #tpu.pipeline_mode<synchronous>, transform_indices = @transform_6, window_bounds = array<i64: 32, 128>}, {transform_indices = @transform_7, window_bounds = array<i64: 2, 8, 128>}]} {
    %c0 = arith.constant 0 : index
    %c0_0 = arith.constant 0 : index
    %c0_1 = arith.constant 0 : index
    %0 = vector.load %arg2[%c0, %c0_0, %c0_1] : memref<2x8x32xbf16, #tpu.memory_space<vmem>>, vector<2x8x32xbf16>
    %1 = vector.shape_cast %0 : vector<2x8x32xbf16> to vector<16x32xbf16>
    %c0_2 = arith.constant 0 : index
    %c0_3 = arith.constant 0 : index
    %c0_4 = arith.constant 0 : index
    %2 = vector.load %arg3[%c0_2, %c0_3, %c0_4] : memref<2x8x32xbf16, #tpu.memory_space<vmem>>, vector<2x8x32xbf16>
    %3 = vector.shape_cast %2 : vector<2x8x32xbf16> to vector<16x32xbf16>
    %c0_5 = arith.constant 0 : index
    %c0_6 = arith.constant 0 : index
    %c0_7 = arith.constant 0 : index
    %4 = vector.load %arg4[%c0_5, %c0_6, %c0_7] : memref<2x8x32xbf16, #tpu.memory_space<vmem>>, vector<2x8x32xbf16>
    %5 = vector.shape_cast %4 : vector<2x8x32xbf16> to vector<16x32xbf16>
    %c0_8 = arith.constant 0 : index
    %c0_9 = arith.constant 0 : index
    %6 = vector.load %arg5[%c0_8, %c0_9] : memref<32x32xbf16, #tpu.memory_space<vmem>>, vector<32x32xbf16>
    %cst = arith.constant dense<0.000000e+00> : vector<16x32xf32>
    %7 = tpu.matmul %1, %6, %cst {dimension_numbers = #tpu.dot_dimension_numbers<[1], [0], [0], [1], [0, 0, 1, 1], [], []>} : vector<16x32xbf16>, vector<32x32xbf16>, vector<16x32xf32> -> vector<16x32xf32>
    %8 = arith.truncf %7 : vector<16x32xf32> to vector<16x32xbf16>
    %c0_10 = arith.constant 0 : index
    %c0_11 = arith.constant 0 : index
    %9 = vector.load %arg6[%c0_10, %c0_11] : memref<32x32xbf16, #tpu.memory_space<vmem>>, vector<32x32xbf16>
    %cst_12 = arith.constant dense<0.000000e+00> : vector<16x32xf32>
    %10 = tpu.matmul %3, %9, %cst_12 {dimension_numbers = #tpu.dot_dimension_numbers<[1], [0], [0], [1], [0, 0, 1, 1], [], []>} : vector<16x32xbf16>, vector<32x32xbf16>, vector<16x32xf32> -> vector<16x32xf32>
    %11 = arith.truncf %10 : vector<16x32xf32> to vector<16x32xbf16>
    %c0_13 = arith.constant 0 : index
    %c0_14 = arith.constant 0 : index
    %12 = vector.load %arg7[%c0_13, %c0_14] : memref<32x32xbf16, #tpu.memory_space<vmem>>, vector<32x32xbf16>
    %cst_15 = arith.constant dense<0.000000e+00> : vector<16x32xf32>
    %13 = tpu.matmul %5, %12, %cst_15 {dimension_numbers = #tpu.dot_dimension_numbers<[1], [0], [0], [1], [0, 0, 1, 1], [], []>} : vector<16x32xbf16>, vector<32x32xbf16>, vector<16x32xf32> -> vector<16x32xf32>
    %14 = arith.truncf %13 : vector<16x32xf32> to vector<16x32xbf16>
    %15 = vector.shape_cast %8 : vector<16x32xbf16> to vector<2x8x32xbf16>
    %16 = vector.extract_strided_slice %15 {offsets = [0, 0, 0], sizes = [2, 8, 8], strides = [1, 1, 1]} : vector<2x8x32xbf16> to vector<2x8x8xbf16>
    %17 = vector.extract_strided_slice %15 {offsets = [0, 0, 8], sizes = [2, 8, 8], strides = [1, 1, 1]} : vector<2x8x32xbf16> to vector<2x8x8xbf16>
    %18 = vector.extract_strided_slice %15 {offsets = [0, 0, 16], sizes = [2, 8, 8], strides = [1, 1, 1]} : vector<2x8x32xbf16> to vector<2x8x8xbf16>
    %19 = vector.extract_strided_slice %15 {offsets = [0, 0, 24], sizes = [2, 8, 8], strides = [1, 1, 1]} : vector<2x8x32xbf16> to vector<2x8x8xbf16>
    %20 = vector.shape_cast %16 : vector<2x8x8xbf16> to vector<2x1x8x8xbf16>
    %21 = vector.shape_cast %17 : vector<2x8x8xbf16> to vector<2x1x8x8xbf16>
    %22 = vector.shape_cast %18 : vector<2x8x8xbf16> to vector<2x1x8x8xbf16>
    %23 = vector.shape_cast %19 : vector<2x8x8xbf16> to vector<2x1x8x8xbf16>
    %24 = tpu.concatenate %20, %21, %22, %23 in 1 : vector<2x1x8x8xbf16>, vector<2x1x8x8xbf16>, vector<2x1x8x8xbf16>, vector<2x1x8x8xbf16> -> vector<2x4x8x8xbf16>
    %25 = vector.shape_cast %24 : vector<2x4x8x8xbf16> to vector<8x8x8xbf16>
    %26 = vector.shape_cast %11 : vector<16x32xbf16> to vector<2x8x32xbf16>
    %27 = vector.extract_strided_slice %26 {offsets = [0, 0, 0], sizes = [2, 8, 8], strides = [1, 1, 1]} : vector<2x8x32xbf16> to vector<2x8x8xbf16>
    %28 = vector.extract_strided_slice %26 {offsets = [0, 0, 8], sizes = [2, 8, 8], strides = [1, 1, 1]} : vector<2x8x32xbf16> to vector<2x8x8xbf16>
    %29 = vector.extract_strided_slice %26 {offsets = [0, 0, 16], sizes = [2, 8, 8], strides = [1, 1, 1]} : vector<2x8x32xbf16> to vector<2x8x8xbf16>
    %30 = vector.extract_strided_slice %26 {offsets = [0, 0, 24], sizes = [2, 8, 8], strides = [1, 1, 1]} : vector<2x8x32xbf16> to vector<2x8x8xbf16>
    %31 = vector.shape_cast %27 : vector<2x8x8xbf16> to vector<2x1x8x8xbf16>
    %32 = vector.shape_cast %28 : vector<2x8x8xbf16> to vector<2x1x8x8xbf16>
    %33 = vector.shape_cast %29 : vector<2x8x8xbf16> to vector<2x1x8x8xbf16>
    %34 = vector.shape_cast %30 : vector<2x8x8xbf16> to vector<2x1x8x8xbf16>
    %35 = tpu.concatenate %31, %32, %33, %34 in 1 : vector<2x1x8x8xbf16>, vector<2x1x8x8xbf16>, vector<2x1x8x8xbf16>, vector<2x1x8x8xbf16> -> vector<2x4x8x8xbf16>
    %36 = vector.shape_cast %35 : vector<2x4x8x8xbf16> to vector<8x8x8xbf16>
    %37 = vector.shape_cast %14 : vector<16x32xbf16> to vector<2x8x32xbf16>
    %38 = vector.extract_strided_slice %37 {offsets = [0, 0, 0], sizes = [2, 8, 8], strides = [1, 1, 1]} : vector<2x8x32xbf16> to vector<2x8x8xbf16>
    %39 = vector.extract_strided_slice %37 {offsets = [0, 0, 8], sizes = [2, 8, 8], strides = [1, 1, 1]} : vector<2x8x32xbf16> to vector<2x8x8xbf16>
    %40 = vector.extract_strided_slice %37 {offsets = [0, 0, 16], sizes = [2, 8, 8], strides = [1, 1, 1]} : vector<2x8x32xbf16> to vector<2x8x8xbf16>
    %41 = vector.extract_strided_slice %37 {offsets = [0, 0, 24], sizes = [2, 8, 8], strides = [1, 1, 1]} : vector<2x8x32xbf16> to vector<2x8x8xbf16>
    %42 = vector.shape_cast %38 : vector<2x8x8xbf16> to vector<2x1x8x8xbf16>
    %43 = vector.shape_cast %39 : vector<2x8x8xbf16> to vector<2x1x8x8xbf16>
    %44 = vector.shape_cast %40 : vector<2x8x8xbf16> to vector<2x1x8x8xbf16>
    %45 = vector.shape_cast %41 : vector<2x8x8xbf16> to vector<2x1x8x8xbf16>
    %46 = tpu.concatenate %42, %43, %44, %45 in 1 : vector<2x1x8x8xbf16>, vector<2x1x8x8xbf16>, vector<2x1x8x8xbf16>, vector<2x1x8x8xbf16> -> vector<2x4x8x8xbf16>
    %47 = vector.shape_cast %46 : vector<2x4x8x8xbf16> to vector<8x8x8xbf16>
    "tpu.trace_start"() <{level = 10 : i32, message = "bqd,bkd->bqk"}> : () -> ()
    %cst_16 = arith.constant dense<0.000000e+00> : vector<8x8x8xf32>
    %48 = tpu.matmul %25, %36, %cst_16 {dimension_numbers = #tpu.dot_dimension_numbers<[2], [2], [1], [1], [0, 0, 0, 1, 1, 1], [0], [0]>} : vector<8x8x8xbf16>, vector<8x8x8xbf16>, vector<8x8x8xf32> -> vector<8x8x8xf32>
    "tpu.trace_stop"() : () -> ()
    %49 = vector.shape_cast %48 : vector<8x8x8xf32> to vector<2x4x8x8xf32>
    %50 = tpu.iota {dimensions = array<i32: 0>} : vector<2x4x8x8xi32>
    %51 = tpu.iota {dimensions = array<i32: 3>} : vector<2x4x8x8xi32>
    %c2_i32 = arith.constant 2 : i32
    %52 = arith.muli %arg0, %c2_i32 : i32
    %c0_i32 = arith.constant 0 : i32
    %53 = arith.addi %52, %c0_i32 : i32
    %54 = arith.index_cast %53 : i32 to index
    %55 = memref.load %arg1[%54] : memref<2xi32, #tpu.memory_space<smem>>
    %c0_i32_17 = arith.constant 0 : i32
    %56 = vector.broadcast %c0_i32_17 : i32 to vector<2x4x8x8xi32>
    %57 = arith.cmpi eq, %50, %56 : vector<2x4x8x8xi32>
    %58 = vector.broadcast %55 : i32 to vector<2x4x8x8xi32>
    %59 = arith.cmpi sge, %51, %58 : vector<2x4x8x8xi32>
    %60 = arith.andi %57, %59 : vector<2x4x8x8xi1>
    %cst_18 = arith.constant -1.000000e+06 : f32
    %61 = vector.broadcast %cst_18 : f32 to vector<2x4x8x8xf32>
    %62 = arith.select %60, %61, %49 : vector<2x4x8x8xi1>, vector<2x4x8x8xf32>
    %c2_i32_19 = arith.constant 2 : i32
    %63 = arith.muli %arg0, %c2_i32_19 : i32
    %c1_i32 = arith.constant 1 : i32
    %64 = arith.addi %63, %c1_i32 : i32
    %65 = arith.index_cast %64 : i32 to index
    %66 = memref.load %arg1[%65] : memref<2xi32, #tpu.memory_space<smem>>
    %c1_i32_20 = arith.constant 1 : i32
    %67 = vector.broadcast %c1_i32_20 : i32 to vector<2x4x8x8xi32>
    %68 = arith.cmpi eq, %50, %67 : vector<2x4x8x8xi32>
    %69 = vector.broadcast %66 : i32 to vector<2x4x8x8xi32>
    %70 = arith.cmpi sge, %51, %69 : vector<2x4x8x8xi32>
    %71 = arith.andi %68, %70 : vector<2x4x8x8xi1>
    %cst_21 = arith.constant -1.000000e+06 : f32
    %72 = vector.broadcast %cst_21 : f32 to vector<2x4x8x8xf32>
    %73 = arith.select %71, %72, %62 : vector<2x4x8x8xi1>, vector<2x4x8x8xf32>
    %74 = vector.shape_cast %73 : vector<2x4x8x8xf32> to vector<8x8x8xf32>
    %cst_22 = arith.constant dense<0xFF800000> : vector<8x8xf32>
    %75 = vector.multi_reduction <maximumf>, %74, %cst_22 [2] : vector<8x8x8xf32> to vector<8x8xf32>
    %76 = vector.shape_cast %75 : vector<8x8xf32> to vector<8x8x1xf32>
    %77 = vector.broadcast %76 : vector<8x8x1xf32> to vector<8x8x8xf32>
    %78 = arith.subf %74, %77 : vector<8x8x8xf32>
    %79 = math.exp %78 : vector<8x8x8xf32>
    %cst_23 = arith.constant dense<0.000000e+00> : vector<8x8xf32>
    %80 = vector.multi_reduction <add>, %79, %cst_23 [2] : vector<8x8x8xf32> to vector<8x8xf32>
    %81 = vector.shape_cast %80 : vector<8x8xf32> to vector<8x8x1xf32>
    %82 = tpu.reciprocal %81 {approx = true} : vector<8x8x1xf32> -> vector<8x8x1xf32>
    %83 = vector.broadcast %82 : vector<8x8x1xf32> to vector<8x8x8xf32>
    %84 = arith.mulf %79, %83 : vector<8x8x8xf32>
    %85 = arith.truncf %84 : vector<8x8x8xf32> to vector<8x8x8xbf16>
    "tpu.trace_start"() <{level = 10 : i32, message = "bqk,bkd->bqd"}> : () -> ()
    %cst_24 = arith.constant dense<0.000000e+00> : vector<8x8x8xf32>
    %86 = tpu.matmul %85, %47, %cst_24 {dimension_numbers = #tpu.dot_dimension_numbers<[2], [1], [1], [2], [0, 0, 0, 1, 1, 2], [0], [0]>} : vector<8x8x8xbf16>, vector<8x8x8xbf16>, vector<8x8x8xf32> -> vector<8x8x8xf32>
    "tpu.trace_stop"() : () -> ()
    %87 = arith.truncf %86 : vector<8x8x8xf32> to vector<8x8x8xbf16>
    %88 = vector.shape_cast %87 : vector<8x8x8xbf16> to vector<2x4x8x8xbf16>
    %89 = vector.extract_strided_slice %88 {offsets = [0, 0, 0, 0], sizes = [2, 1, 8, 8], strides = [1, 1, 1, 1]} : vector<2x4x8x8xbf16> to vector<2x1x8x8xbf16>
    %90 = vector.shape_cast %89 : vector<2x1x8x8xbf16> to vector<2x8x8xbf16>
    %91 = vector.extract_strided_slice %88 {offsets = [0, 1, 0, 0], sizes = [2, 1, 8, 8], strides = [1, 1, 1, 1]} : vector<2x4x8x8xbf16> to vector<2x1x8x8xbf16>
    %92 = vector.shape_cast %91 : vector<2x1x8x8xbf16> to vector<2x8x8xbf16>
    %93 = vector.extract_strided_slice %88 {offsets = [0, 2, 0, 0], sizes = [2, 1, 8, 8], strides = [1, 1, 1, 1]} : vector<2x4x8x8xbf16> to vector<2x1x8x8xbf16>
    %94 = vector.shape_cast %93 : vector<2x1x8x8xbf16> to vector<2x8x8xbf16>
    %95 = vector.extract_strided_slice %88 {offsets = [0, 3, 0, 0], sizes = [2, 1, 8, 8], strides = [1, 1, 1, 1]} : vector<2x4x8x8xbf16> to vector<2x1x8x8xbf16>
    %96 = vector.shape_cast %95 : vector<2x1x8x8xbf16> to vector<2x8x8xbf16>
    %97 = tpu.concatenate %90, %92, %94, %96 in 2 : vector<2x8x8xbf16>, vector<2x8x8xbf16>, vector<2x8x8xbf16>, vector<2x8x8xbf16> -> vector<2x8x32xbf16>
    %98 = vector.shape_cast %97 : vector<2x8x32xbf16> to vector<16x32xbf16>
    %c0_25 = arith.constant 0 : index
    %c0_26 = arith.constant 0 : index
    %99 = vector.load %arg8[%c0_25, %c0_26] : memref<32x128xbf16, #tpu.memory_space<vmem>>, vector<32x128xbf16>
    %cst_27 = arith.constant dense<0.000000e+00> : vector<16x128xf32>
    %100 = tpu.matmul %98, %99, %cst_27 {dimension_numbers = #tpu.dot_dimension_numbers<[1], [0], [0], [1], [0, 0, 1, 1], [], []>} : vector<16x32xbf16>, vector<32x128xbf16>, vector<16x128xf32> -> vector<16x128xf32>
    %101 = vector.shape_cast %100 : vector<16x128xf32> to vector<2x8x128xf32>
    %c0_28 = arith.constant 0 : index
    %c0_29 = arith.constant 0 : index
    %c0_30 = arith.constant 0 : index
    %102 = vector.load %arg9[%c0_28, %c0_29, %c0_30] : memref<2x8x128xf32, #tpu.memory_space<vmem>>, vector<2x8x128xf32>
    tpu.vector_store %arg9[%c0_28, %c0_29, %c0_30], %101 {strides = array<i32>} : memref<2x8x128xf32, #tpu.memory_space<vmem>>, vector<2x8x128xf32>,
    return
  }
  func.func @transform_0(%arg0: i32, %arg1: memref<2xi32, #tpu.memory_space<smem>>) -> (i32, i32, i32) {
    %c0_i32 = arith.constant 0 : i32
    %c0_i32_0 = arith.constant 0 : i32
    %c0_i32_1 = arith.constant 0 : i32
    return %arg0, %c0_i32, %c0_i32_0 : i32, i32, i32
  }
  func.func @transform_1(%arg0: i32, %arg1: memref<2xi32, #tpu.memory_space<smem>>) -> (i32, i32, i32) {
    %c0_i32 = arith.constant 0 : i32
    %c0_i32_0 = arith.constant 0 : i32
    %c0_i32_1 = arith.constant 0 : i32
    return %arg0, %c0_i32, %c0_i32_0 : i32, i32, i32
  }
  func.func @transform_2(%arg0: i32, %arg1: memref<2xi32, #tpu.memory_space<smem>>) -> (i32, i32, i32) {
    %c0_i32 = arith.constant 0 : i32
    %c0_i32_0 = arith.constant 0 : i32
    %c0_i32_1 = arith.constant 0 : i32
    return %arg0, %c0_i32, %c0_i32_0 : i32, i32, i32
  }
  func.func @transform_3(%arg0: i32, %arg1: memref<2xi32, #tpu.memory_space<smem>>) -> (i32, i32) {
    %c0_i32 = arith.constant 0 : i32
    %c0_i32_0 = arith.constant 0 : i32
    %c0_i32_1 = arith.constant 0 : i32
    return %c0_i32, %c0_i32_0 : i32, i32
  }
  func.func @transform_4(%arg0: i32, %arg1: memref<2xi32, #tpu.memory_space<smem>>) -> (i32, i32) {
    %c0_i32 = arith.constant 0 : i32
    %c0_i32_0 = arith.constant 0 : i32
    %c0_i32_1 = arith.constant 0 : i32
    return %c0_i32, %c0_i32_0 : i32, i32
  }
  func.func @transform_5(%arg0: i32, %arg1: memref<2xi32, #tpu.memory_space<smem>>) -> (i32, i32) {
    %c0_i32 = arith.constant 0 : i32
    %c0_i32_0 = arith.constant 0 : i32
    %c0_i32_1 = arith.constant 0 : i32
    return %c0_i32, %c0_i32_0 : i32, i32
  }
  func.func @transform_6(%arg0: i32, %arg1: memref<2xi32, #tpu.memory_space<smem>>) -> (i32, i32) {
    %c0_i32 = arith.constant 0 : i32
    %c0_i32_0 = arith.constant 0 : i32
    %c0_i32_1 = arith.constant 0 : i32
    return %c0_i32, %c0_i32_0 : i32, i32
  }
  func.func @transform_7(%arg0: i32, %arg1: memref<2xi32, #tpu.memory_space<smem>>) -> (i32, i32, i32) {
    %c0_i32 = arith.constant 0 : i32
    %c0_i32_0 = arith.constant 0 : i32
    %c0_i32_1 = arith.constant 0 : i32
    return %arg0, %c0_i32, %c0_i32_0 : i32, i32, i32
  }
}

</mosaic_0001>

<bundles_post_ra>
// kernel: tpu_custom_call.1
= control target key start
LH: loop header
LB: loop body
LE: loop exit
PB: predicated region body
PF: predicated region fallthrough
CT: control target
= control target key end

     0   :  { %s2245_s0 = inlined_call_operand.hbm [shape: s32[2], index: 0, kind: input, shape index: {}]   ;;  %s2246_s1 = inlined_call_operand.hbm [shape: bf16[2,8,32], index: 1, kind: input, shape index: {}]   ;;  %s2247_s2 = inlined_call_operand.hbm [shape: bf16[2,8,32], index: 2, kind: input, shape index: {}]   ;;  %s2248_s3 = inlined_call_operand.hbm [shape: bf16[2,8,32], index: 3, kind: input, shape index: {}]   ;;  %s2249_s4 = inlined_call_operand.hbm [shape: bf16[32,32], index: 4, kind: input, shape index: {}]   ;;  %s2250_s5 = inlined_call_operand.vmem [shape: bf16[32,32], index: 5, kind: input, shape index: {}]   ;;  %s2251_s6 = inlined_call_operand.hbm [shape: bf16[32,32], index: 6, kind: input, shape index: {}]   ;;  %s2252_s7 = inlined_call_operand.hbm [shape: bf16[32,128], index: 7, kind: input, shape index: {}]   ;;  %s2253_s8 = inlined_call_operand.hbm [shape: f32[2,8,128], index: 8, kind: output, shape index: {}]  }
   0x1   :  { %s1643_s29 = scalar_lea.hbm %s2245_s0, 16 }
   0x2   :  { %p1644_p0 = scmp.ne.s32.totalorder %s2245_s0, %s1643_s29  ;;  %p1647_p1 = scmp.lt.u32.totalorder %s1643_s29, %s2245_s0 }
   0x4   :  { %p1649_p2 = pnand %p1647_p1, %p1644_p0 }
   0x6   :  { %1652 = shalt.err (!%p1649_p2)  }
   0x7   :  { %s1819_s12 = smov [#allocation3]  }
   0x8   :  { %14 = dma.hbm_to_smem %s2245_s0, 16, %s1819_s12, [#allocation2] }
   0x9   :  { %1807 = dma.done.wait [#allocation2], 16 }
   0xa   :  { %1808 = vsyncadd [#allocation2], 4294967280 }
   0xb   :  { %16 = sfence }
   0xc   :  { %17 = vsyncpa [#allocation5], 0 }
   0xd   :  { %18 = vsyncpa [#allocation8], 0 }
   0xe   :  { %19 = vsyncpa [#allocation11], 0 }
   0xf   :  { %20 = vsyncpa [#allocation14], 0 }
  0x10   :  { %21 = vsyncpa [#allocation6], 0  ;;  %s1820_s15 = smov [#allocation7]   ;;  %s1821_s17 = smov [#allocation10]  }
  0x11   :  { %s39_s16 = sshll.u32 %s1820_s15, 4  ;;  %s63_s18 = sshll.u32 %s1821_s17, 4  ;;  %s40_s16 = int_to_ptr.vmem [resolvable:$true] %s39_s16  ;;  %s1895_s18 = int_to_ptr.vmem [resolvable:$true] %s63_s18 }
  0x12   :  { %s1653_s21 = scalar_lea.hbm %s2247_s2, 128 }
  0x13   :  { %p1654_p3 = scmp.ne.s32.totalorder %s2247_s2, %s1653_s21  ;;  %p1657_p4 = scmp.lt.u32.totalorder %s1653_s21, %s2247_s2 }
  0x15   :  { %p1659_p5 = pnand %p1657_p4, %p1654_p3 }
  0x17   :  { %1662 = shalt.err (!%p1659_p5)
}
  0x18   :  { %s1663_s25 = scalar_lea.vmem %s40_s16, 128  ;;  %p1668_p7 = scmp.lt.s32.totalorder %s40_s16, %s40_s16 }
  0x19   :  { %p1664_p6 = scmp.ne.s32.totalorder %s40_s16, %s1663_s25  ;;  %p1669_p8 = scmp.lt.s32.totalorder %s1663_s25, %s1663_s25 }
  0x1b   :  { %p1670_p9 = por %p1669_p8, %p1668_p7 }
  0x1d   :  { %p1671_p10 = pnand %p1670_p9, %p1664_p6 }
  0x1f   :  { %1674 = shalt.err (!%p1671_p10)
}
  0x20   :  { %s1822_s26 = smov 64   ;;  %s1823_s27 = smov 4  }
  0x21   :  { %45 = dma.hbm_to_vmem [thread:$0]  %s2247_s2, 128, %s40_s16, [#allocation8], %s1822_s26, %s1822_s26, %s1823_s27  }
  0x22   :  { %s1675_s10 = scalar_lea.hbm %s2249_s4, 256 }
  0x23   :  { %p1676_p11 = scmp.ne.s32.totalorder %s2249_s4, %s1675_s10  ;;  %p1679_p12 = scmp.lt.u32.totalorder %s1675_s10, %s2249_s4 }
  0x25   :  { %p1681_p13 = pnand %p1679_p12, %p1676_p11 }
  0x27   :  { %1684 = shalt.err (!%p1681_p13)
}
  0x28   :  { %s1685_s15 = scalar_lea.vmem %s1895_s18, 256  ;;  %p1690_p1 = scmp.lt.s32.totalorder %s1895_s18, %s1895_s18 }
  0x29   :  { %p1686_p0 = scmp.ne.s32.totalorder %s1895_s18, %s1685_s15  ;;  %p1691_p2 = scmp.lt.s32.totalorder %s1685_s15, %s1685_s15 }
  0x2b   :  { %p1692_p3 = por %p1691_p2, %p1690_p1 }
  0x2d   :  { %p1693_p4 = pnand %p1692_p3, %p1686_p0 }
  0x2f   :  { %1696 = shalt.err (!%p1693_p4)
}
  0x30   :  { %69 = dma.hbm_to_vmem [thread:$0]  %s2249_s4, 256, %s1895_s18, [#allocation11], %s1822_s26, %s1822_s26, %s1823_s27  }
  0x31   :  { %s1824_s17 = smov [#allocation4]   ;;  %s1825_s20 = smov [#allocation9]  }
  0x32   :  { %s27_s19 = sshll.u32 %s1824_s17, 4  ;;  %s51_s21 = sshll.u32 %s1825_s20, 4  ;;  %s28_s19 = int_to_ptr.vmem [resolvable:$true] %s27_s19  ;;  %s1932_s21 = int_to_ptr.vmem [resolvable:$true] %s51_s21 }
  0x33   :  { %s1697_s23 = scalar_lea.hbm %s2246_s1, 128 }
  0x34   :  { %p1698_p5 = scmp.ne.s32.totalorder %s2246_s1, %s1697_s23  ;;  %p1701_p6 = scmp.lt.u32.totalorder %s1697_s23, %s2246_s1 }
  0x36   :  { %p1703_p7 = pnand %p1701_p6, %p1698_p5 }
  0x38   :  { %1706 = shalt.err (!%p1703_p7)
}
  0x39   :  { %s1707_s4 = scalar_lea.vmem %s28_s19, 128  ;;  %p1712_p9 = scmp.lt.s32.totalorder %s28_s19, %s28_s19 }
  0x3a   :  { %p1708_p8 = scmp.ne.s32.totalorder %s28_s19, %s1707_s4  ;;  %p1713_p10 = scmp.lt.s32.totalorder %s1707_s4, %s1707_s4 }
  0x3c   :  { %p1714_p11 = por %p1713_p10, %p1712_p9 }
  0x3e   :  { %p1715_p12 = pnand %p1714_p11, %p1708_p8 }
  0x40   :  { %1718 = shalt.err (!%p1715_p12)
}
  0x41   :  { %33 = dma.hbm_to_vmem [thread:$0]  %s2246_s1, 128, %s28_s19, [#allocation5], %s1822_s26, %s1822_s26, %s1823_s27  }
  0x42   :  { %s1719_s11 = scalar_lea.hbm %s2248_s3, 128 }
  0x43   :  { %p1720_p13 = scmp.ne.s32.totalorder %s2248_s3, %s1719_s11  ;;  %p1723_p0 = scmp.lt.u32.totalorder %s1719_s11, %s2248_s3 }
  0x45   :  { %p1725_p1 = pnand %p1723_p0, %p1720_p13 }
  0x47   :  { %1728 = shalt.err (!%p1725_p1)
}
  0x48   :  { %s1729_s2 = scalar_lea.vmem %s1932_s21, 128  ;;  %p1734_p3 = scmp.lt.s32.totalorder %s1932_s21, %s1932_s21 }
  0x49   :  { %p1730_p2 = scmp.ne.s32.totalorder %s1932_s21, %s1729_s2  ;;  %p1735_p4 = scmp.lt.s32.totalorder %s1729_s2, %s1729_s2 }
  0x4b   :  { %p1736_p5 = por %p1735_p4, %p1734_p3 }
  0x4d   :  { %p1737_p6 = pnand %p1736_p5, %p1730_p2 }
  0x4f   :  { %1740 = shalt.err (!%p1737_p6)
}
  0x50   :  { %57 = dma.hbm_to_vmem [thread:$0]  %s2248_s3, 128, %s1932_s21, [#allocation8], %s1822_s26, %s1822_s26, %s1823_s27  }
  0x51   :  { %s1826_s17 = smov [#allocation12]   ;;  %s1827_s20 = smov [#allocation13]  }
  0x52   :  { %s77_s19 = sshll.u32 %s1826_s17, 4  ;;  %s89_s0 = sshll.u32 %s1827_s20, 4  ;;  %s78_s19 = int_to_ptr.vmem [resolvable:$true] %s77_s19  ;;  %s1969_s0 = int_to_ptr.vmem [resolvable:$true] %s89_s0 }
  0x53   :  { %s1741_s24 = scalar_lea.hbm %s2251_s6, 256 }
  0x54   :  { %p1742_p7 = scmp.ne.s32.totalorder %s2251_s6, %s1741_s24  ;;  %p1745_p8 = scmp.lt.u32.totalorder %s1741_s24, %s2251_s6 }
  0x56   :  { %p1747_p9 = pnand %p1745_p8, %p1742_p7 }
  0x58   :  { %1750 = shalt.err (!%p1747_p9)
}
  0x59   :  { %s1751_s3 = scalar_lea.vmem %s78_s19, 256  ;;  %p1756_p11 = scmp.lt.s32.totalorder %s78_s19, %s78_s19 }
  0x5a   :  { %p1752_p10 = scmp.ne.s32.totalorder %s78_s19, %s1751_s3  ;;  %p1757_p12 = scmp.lt.s32.totalorder %s1751_s3, %s1751_s3 }
  0x5c   :  { %p1758_p13 = por %p1757_p12, %p1756_p11 }
  0x5e   :  { %p1759_p0 = pnand %p1758_p13, %p1752_p10 }
  0x60   :  { %1762 = shalt.err (!%p1759_p0)
}
  0x61   :  { %83 = dma.hbm_to_vmem [thread:$0]  %s2251_s6, 256, %s78_s19, [#allocation11], %s1822_s26, %s1822_s26, %s1823_s27  }
  0x62   :  { %s1763_s10 = scalar_lea.hbm %s2252_s7, 256 }
  0x63   :  { %p1764_p1 = scmp.ne.s32.totalorder %s2252_s7, %s1763_s10  ;;  %p1767_p2 = scmp.lt.u32.totalorder %s1763_s10, %s2252_s7 }
  0x65   :  { %p1769_p3 = pnand %p1767_p2, %p1764_p1 }
  0x67   :  { %1772 = shalt.err (!%p1769_p3)
}
  0x68   :  { %s1773_s15 = scalar_lea.vmem %s1969_s0, 256  ;;  %p1778_p5 = scmp.lt.s32.totalorder %s1969_s0, %s1969_s0 }
  0x69   :  { %p1774_p4 = scmp.ne.s32.totalorder %s1969_s0, %s1773_s15  ;;  %p1779_p6 = scmp.lt.s32.totalorder %s1773_s15, %s1773_s15 }
  0x6b   :  { %p1780_p7 = por %p1779_p6, %p1778_p5 }
  0x6d   :  { %p1781_p8 = pnand %p1780_p7, %p1774_p4 }
  0x6f   :  { %1784 = shalt.err (!%p1781_p8)
}
  0x70   :  { %95 = dma.hbm_to_vmem [thread:$0]  %s2252_s7, 256, %s1969_s0, [#allocation14], %s1822_s26, %s1822_s26, %s1823_s27  }
  0x71   :  { %1809 = dma.done.wait [#allocation5], 128  }
  0x72   :  { %1810 = vsyncadd [#allocation5], 4294967168 }
  0x73   :  { %1811 = dma.done.wait [#allocation8], 256  }
  0x74   :  { %1812 = vsyncadd [#allocation8], 4294967040 }
  0x75   :  { %1813 = dma.done.wait [#allocation11], 512  }
  0x76   :  { %1814 = vsyncadd [#allocation11], 4294966784 }
  0x77   :  { %1815 = dma.done.wait [#allocation14], 256  }
  0x78   :  { %1816 = vsyncadd [#allocation14], 4294967040  ;;  %v1828_v0 = vmov 0.0   ;;  %vm1829_vm0 = vmmov 0   ;;  %v1600_v1 = vld [vmem:[#allocation10] sm:$0xff]   ;;  %v1601_v2 = vld [vmem:[%s2250_s5] sm:$0xff]   ;;  %v740_v48 = vlaneseq }
  0x79   :  { %1453 = vmatprep.subr.bf16.mxu0 %v1828_v0  ;;  %1461 = vmatprep.subr.bf16.mxu1 %v1828_v0  ;;  %v1602_v3 = vld [vmem:[#allocation10 + $0x8] sm:$0xff]   ;;  %v1603_v4 = vld [vmem:[%s2250_s5 + $0x8] sm:$0xff]   ;;  %vm142_vm1 = vcmask 261120   ;;  %v1605_v6 = vld [vmem:[#allocation7] sm:$0xff]   ;;  %vm371_vm2 = vcmask 64512   ;;  %s1830_s5 = smov 120  }
  0x7a   :  { %1457 = vmatprep.mubr.msk.bf16.mxu0 %vm1829_vm0, %v1828_v0  ;;  %1465 = vmatprep.mubr.msk.bf16.mxu1 %vm1829_vm0, %v1828_v0  ;;  %v1604_v5 = vld [vmem:[#allocation4] sm:$0xff]   ;;  %v1606_v7 = vld [vmem:[#allocation12] sm:$0xff]   ;;  %v1607_v8 = vld [vmem:[#allocation12 + $0x8] sm:$0xff]   ;;  %s1831_s16 = smov 104   ;;  %s1832_s17 = smov 112   ;;  %vm869_vm3 = vcmask 1043456  }
  0x7b   :  { %1454 = vmatpush3.bf16.msra.mxu0 %v1600_v1  ;;  %1462 = vmatpush3.bf16.msra.mxu1 %v1601_v2  ;;  %v1608_v9 = vld [vmem:[#allocation9] sm:$0xff]   ;;  %s743_s19 = sld [smem:[#allocation3]]  ;;  %v741_v49 = vand.u32 127, %v740_v48  ;;  %s1390_s20 = sld [smem:[#allocation3 + $0x1]]  ;;  %vm1267_vm6 = vcmask 130048   ;;  %vm1272_vm7 = vcmask 195584  }
  0x7c   :  { %1455 = vmatprep.subr.bf16.mxu0 %v1828_v0  ;;  %1463 = vmatprep.subr.bf16.mxu1 %v1828_v0  ;;  %s1833_s0 = smov 8   ;;  %s1834_s22 = smov 16  }
  0x7d   :  { %s1835_s23 = smov 24   ;;  %s1836_s24 = smov [#allocation15]  }
  0x7e   :  { %s1349_s25 = sshll.u32 %s1836_s24, 4  ;;  %s1350_s25 = int_to_ptr.vmem [resolvable:$true] %s1349_s25 }
  0x7f   :  { %1456 = vmatpush3.bf16.msra.mxu0 %v1602_v3  ;;  %1464 = vmatpush3.bf16.msra.mxu1 %v1603_v4  ;;  %s1785_s28 = scalar_lea.vmem %s1350_s25, 256  ;;  %p1790_p10 = scmp.lt.s32.totalorder %s1350_s25, %s1350_s25 }
  0x80   :  { %1469 = vmatprep.subr.bf16.mxu0 %v1828_v0  ;;  %1477 = vmatprep.subr.bf16.mxu1 %v1828_v0  ;;  %p1786_p9 = scmp.ne.s32.totalorder %s1350_s25, %s1785_s28  ;;  %p1791_p11 = scmp.lt.s32.totalorder %s1785_s28, %s1785_s28 }
  0x81   :  { %v744_v50 = vstv %s743_s19 }
  0x82   :  { %1458 = vmatmul.mubr.msk.bf16.vlgmr.msra.gmra.mrb[0].mxu0 %vm142_vm1, %v1604_v5  ;;  %1466 = vmatmul.mubr.msk.bf16.vlgmr.msra.gmra.mrb[0].mxu1 %vm142_vm1, %v1605_v6  ;;  %vm2092_vm4 = vcmp.ge.s32.totalorder %v741_v49, %v744_v50  ;;  %p1792_p12 = por %p1791_p11, %p1790_p10 }
  0x83   :  { %1473 = vmatprep.mubr.msk.bf16.mxu0 %vm1829_vm0, %v1828_v0  ;;  %1479 = vmatprep.mubr.msk.bf16.mxu1 %vm1829_vm0, %v1828_v0 }
  0x84   :  { %1470 = vmatpush3.bf16.msra.mxu0 %v1606_v7  ;;  %v758_v7 = vstv %s1390_s20  ;;  %p1793_p13 = pnand %p1792_p12, %p1786_p9 }
  0x85   :  { %1471 = vmatprep.subr.bf16.mxu0 %v1828_v0  ;;  %vm2108_vm5 = vcmp.ge.s32.totalorder %v741_v49, %v758_v7 }
  0x88   :  { %1472 = vmatpush3.bf16.msra.mxu0 %v1607_v8 }
  0x89   :  { %1483 = vmatprep.subr.bf16.mxu0 %v1828_v0 }
  0x8b   :  { %1474 = vmatmul.mubr.msk.bf16.vlgmr.msra.gmra.mrb[4].mxu0 %vm142_vm1, %v1608_v9 }
  0x8c   :  { %1485 = vmatprep.mubr.msk.bf16.mxu0 %vm1829_vm0, %v1828_v0 }
 0x155   :  { %v180_v10 = vpop.f32.mrb[0].mxu0  ;;  %v246_v12 = vpop.f32.mrb[0].mxu1 }
 0x156   :  { %v1403_v11 = vpack.c.bf16 %v180_v10, %v180_v10  ;;  %v1459_v13 = vpop.f32.mrb[1].mxu0  ;;  %v1405_v14 = vpack.c.bf16 %v246_v12, %v246_v12  ;;  %v1467_v15 = vpop.f32.mrb[1].mxu1 }
 0x157   :  { %v183_v16 = vpop.f32.mrb[2].mxu0  ;;  %v249_v17 = vpop.f32.mrb[2].mxu1 }
 0x158   :  { %325 = vrot.lane.b32.xlu1 %v1403_v11, %s1830_s5  ;;  %v1460_v18 = vpop.f32.mrb[3].mxu0  ;;  %342 = vrot.lane.b32.xlu0 %v1405_v14, %s1830_s5  ;;  %v1468_v19 = vpop.f32.mrb[3].mxu1  ;;  %v376_v20 = vsel %vm371_vm2, %v1405_v14, 0  ;;  %v1406_v21 = vpack.c.bf16 %v249_v17, %v249_v17  ;;  %v1404_v22 = vpack.c.bf16 %v183_v16, %v183_v16 }
 0x159   :  { %1478 = vmatpush3.bf16.xpose.msra.mxu1 %v376_v20 }
 0x15a   :  { %1489 = vmatprep.subr.bf16.mxu1 %v1828_v0  ;;  %v560_v32 = vsel %vm371_vm2, %v1406_v21, 0 }
 0x15c   :  { %350 = vrot.lane.b32.xlu1 %v1405_v14, %s1831_s16  ;;  %346 = vrot.lane.b32.xlu0 %v1405_v14, %s1832_s17 }
 0x15e   :  { %v312_v42 = vpop.f32.mrb[4].mxu0 }
 0x15f   :  { %v1475_v43 = vpop.f32.mrb[5].mxu0  ;;  %v2087_v45 = vpack.c.bf16 %v312_v42, %v312_v42 }
 0x160   :  { %333 = vrot.lane.b32.xlu1 %v1403_v11, %s1831_s16  ;;  %329 = vrot.lane.b32.xlu0 %v1403_v11, %s1832_s17  ;;  %v2085_v44 = vpop.f32.mrb[6].mxu0 }
 0x161   :  { %1480 = vmatmul.mubr.msk.bf16.vlgmr.msra.gmra.mrb[4].mxu1 %vm371_vm2, %v1403_v11  ;;  %v1476_v46 = vpop.f32.mrb[7].mxu0  ;;  %v871_v47 = vsel %vm869_vm3, %v2087_v45, 0 }
 0x162   :  { %1491 = vmatprep.mubr.msk.bf16.mxu1 %vm1829_vm0, %v1828_v0 }
 0x164   :  { %348 = vrot.lane.b32.xlu1 %v1406_v21, %s1832_s17  ;;  %344 = vrot.lane.b32.xlu0 %v1406_v21, %s1830_s5 }
 0x168   :  { %352 = vrot.lane.b32.xlu1 %v1406_v21, %s1831_s16  ;;  %327 = vrot.lane.b32.xlu0 %v1404_v22, %s1830_s5 }
 0x16c   :  { %335 = vrot.lane.b32.xlu1 %v1404_v22, %s1831_s16  ;;  %331 = vrot.lane.b32.xlu0 %v1404_v22, %s1832_s17 }
 0x1ca   :  { %v326_v23 = vpop.permute.xlu1 %325  ;;  %v343_v24 = vpop.permute.xlu0 %342 }
 0x1cb   :  { %v422_v25 = vsel %vm371_vm2, %v343_v24, 0 }
 0x1cc   :  { %1484 = vmatpush3.bf16.xpose.msra.mxu0 %v422_v25 }
 0x1cd   :  { %1495 = vmatprep.subr.bf16.mxu0 %v1828_v0 }
 0x1ce   :  { %v347_v26 = vpop.permute.xlu0 %346  ;;  %v351_v27 = vpop.permute.xlu1 %350 }
 0x1cf   :  { %v468_v28 = vsel %vm371_vm2, %v347_v26, 0  ;;  %v514_v30 = vsel %vm371_vm2, %v351_v27, 0 }
 0x1d0   :  { %1490 = vmatpush3.bf16.xpose.msra.mxu1 %v468_v28 }
 0x1d1   :  { %1501 = vmatprep.subr.bf16.mxu1 %v1828_v0 }
 0x1d2   :  { %v330_v29 = vpop.permute.xlu0 %329  ;;  %v334_v31 = vpop.permute.xlu1 %333 }
 0x1d3   :  { %1486 = vmatmul.mubr.msk.bf16.vlgmr.msra.gmra.mrb[8].mxu0 %vm371_vm2, %v326_v23 }
 0x1d4   :  { %1496 = vmatpush3.bf16.xpose.msra.mxu0 %v514_v30  ;;  %1497 = vmatprep.mubr.msk.bf16.mxu0 %vm1829_vm0, %v1828_v0 }
 0x1d5   :  { %1507 = vmatprep.subr.bf16.mxu0 %v1828_v0 }
 0x1d6   :  { %v345_v33 = vpop.permute.xlu0 %344  ;;  %v349_v34 = vpop.permute.xlu1 %348 }
 0x1d7   :  { %1492 = vmatmul.mubr.msk.bf16.vlgmr.msra.gmra.mrb[8].mxu1 %vm371_vm2, %v330_v29  ;;  %v606_v35 = vsel %vm371_vm2, %v345_v33, 0  ;;  %v652_v36 = vsel %vm371_vm2, %v349_v34, 0 }
 0x1d8   :  { %1502 = vmatpush3.bf16.xpose.msra.mxu1 %v560_v32  ;;  %1503 = vmatprep.mubr.msk.bf16.mxu1 %vm1829_vm0, %v1828_v0 }
 0x1d9   :  { %1513 = vmatprep.subr.bf16.mxu1 %v1828_v0 }
 0x1da   :  { %v353_v37 = vpop.permute.xlu1 %352  ;;  %v328_v38 = vpop.permute.xlu0 %327 }
 0x1db   :  { %1498 = vmatmul.mubr.msk.bf16.vlgmr.msra.gmra.mrb[12].mxu0 %vm371_vm2, %v334_v31  ;;  %v698_v39 = vsel %vm371_vm2, %v353_v37, 0 }
 0x1dc   :  { %1508 = vmatpush3.bf16.xpose.msra.mxu0 %v606_v35  ;;  %1509 = vmatprep.mubr.msk.bf16.mxu0 %vm1829_vm0, %v1828_v0 }
 0x1dd   :  { %1519 = vmatprep.subr.bf16.mxu0 %v1828_v0 }
 0x1de   :  { %v332_v40 = vpop.permute.xlu0 %331  ;;  %v336_v41 = vpop.permute.xlu1 %335 }
 0x1df   :  { %1504 = vmatmul.mubr.msk.bf16.vlgmr.msra.gmra.mrb[12].mxu1 %vm371_vm2, %v1404_v22 }
 0x1e0   :  { %1514 = vmatpush3.bf16.xpose.msra.mxu1 %v652_v36  ;;  %1515 = vmatprep.mubr.msk.bf16.mxu1 %vm1829_vm0, %v1828_v0 }
 0x1e1   :  { %1525 = vmatprep.subr.bf16.mxu1 %v1828_v0 }
 0x1e3   :  { %1510 = vmatmul.mubr.msk.bf16.vlgmr.msra.gmra.mrb[16].mxu0 %vm371_vm2, %v328_v38 }
 0x1e4   :  { %1520 = vmatpush3.bf16.xpose.msra.mxu0 %v698_v39  ;;  %1521 = vmatprep.mubr.msk.bf16.mxu0 %vm1829_vm0, %v1828_v0 }
 0x1e5   :  { %1531 = vmatprep.subr.bf16.mxu0 %v1828_v0 }
 0x1e7   :  { %1516 = vmatmul.mubr.msk.bf16.vlgmr.msra.gmra.mrb[16].mxu1 %vm371_vm2, %v332_v40 }
 0x1e8   :  { %1527 = vmatprep.mubr.msk.bf16.mxu1 %vm1829_vm0, %v1828_v0  ;;  %1526 = vmatpush3.bf16.msra.mxu1 %v871_v47 }
 0x1e9   :  { %1537 = vmatprep.subr.bf16.mxu1 %v1828_v0 }
 0x1eb   :  { %1522 = vmatmul.mubr.msk.bf16.vlgmr.msra.gmra.mrb[20].mxu0 %vm371_vm2, %v336_v41 }
 0x1ec   :  { %1533 = vmatprep.mubr.msk.bf16.mxu0 %vm1829_vm0, %v1828_v0 }
 0x234   :  { %v412_v52 = vpop.f32.mrb[4].mxu1 }
 0x235   :  { %v748_v53 = vsel %vm2092_vm4, -1000000.0, %v412_v52  ;;  %v1481_v54 = vpop.f32.mrb[5].mxu1 }
 0x236   :  { %v415_v55 = vpop.f32.mrb[6].mxu1  ;;  %v770_v56 = vsel %vm371_vm2, %v748_v53, -inf }
 0x237   :  { %v1482_v57 = vpop.f32.mrb[7].mxu1  ;;  %771 = vmax.xlane.f32.xlu0 %v770_v56 }
 0x2a6   :  { %v458_v58 = vpop.f32.mrb[8].mxu0 }
 0x2a7   :  { %v749_v59 = vsel %vm2092_vm4, -1000000.0, %v458_v58  ;;  %v1487_v60 = vpop.f32.mrb[9].mxu0 }
 0x2a8   :  { %v461_v61 = vpop.f32.mrb[10].mxu0  ;;  %v773_v62 = vsel %vm371_vm2, %v749_v59, -inf }
 0x2a9   :  { %774 = vmax.xlane.f32.xlu1 %v773_v62  ;;  %v1488_v63 = vpop.f32.mrb[11].mxu0 }
 0x2aa   :  { %v504_v1 = vpop.f32.mrb[8].mxu1 }
 0x2ab   :  { %v750_v2 = vsel %vm2092_vm4, -1000000.0, %v504_v1  ;;  %v1493_v3 = vpop.f32.mrb[9].mxu1 }
 0x2ac   :  { %v507_v4 = vpop.f32.mrb[10].mxu1  ;;  %v776_v5 = vsel %vm371_vm2, %v750_v2, -inf }
 0x2ad   :  { %v1494_v6 = vpop.f32.mrb[11].mxu1  ;;  %777 = vmax.xlane.f32.xlu0 %v776_v5 }
 0x2ae   :  { %v550_v8 = vpop.f32.mrb[12].mxu0 }
 0x2af   :  { %v751_v9 = vsel %vm2092_vm4, -1000000.0, %v550_v8  ;;  %v1499_v10 = vpop.f32.mrb[13].mxu0 }
 0x2b0   :  { %v553_v11 = vpop.f32.mrb[14].mxu0  ;;  %v779_v12 = vsel %vm371_vm2, %v751_v9, -inf }
 0x2b1   :  { %780 = vmax.xlane.f32.xlu0 %v779_v12  ;;  %v1500_v14 = vpop.f32.mrb[15].mxu0 }
 0x2b2   :  { %v596_v15 = vpop.f32.mrb[12].mxu1 }
 0x2b3   :  { %v2114_v16 = vsel %vm2108_vm5, -1000000.0, %v596_v15  ;;  %v1505_v17 = vpop.f32.mrb[13].mxu1 }
 0x2b4   :  { %v599_v18 = vpop.f32.mrb[14].mxu1  ;;  %v782_v19 = vsel %vm371_vm2, %v2114_v16, -inf }
 0x2b5   :  { %v1506_v20 = vpop.f32.mrb[15].mxu1  ;;  %783 = vmax.xlane.f32.xlu1 %v782_v19 }
 0x2b6   :  { %v642_v21 = vpop.f32.mrb[16].mxu0 }
 0x2b7   :  { %v2120_v22 = vsel %vm2108_vm5, -1000000.0, %v642_v21  ;;  %v1511_v23 = vpop.f32.mrb[17].mxu0 }
 0x2b8   :  { %v645_v24 = vpop.f32.mrb[18].mxu0  ;;  %v785_v25 = vsel %vm371_vm2, %v2120_v22, -inf }
 0x2b9   :  { %786 = vmax.xlane.f32.xlu0 %v785_v25  ;;  %v1512_v26 = vpop.f32.mrb[19].mxu0 }
 0x2ba   :  { %v688_v27 = vpop.f32.mrb[16].mxu1 }
 0x2bb   :  { %v768_v28 = vsel %vm2108_vm5, -1000000.0, %v688_v27  ;;  %v1517_v29 = vpop.f32.mrb[17].mxu1 }
 0x2bc   :  { %v691_v30 = vpop.f32.mrb[18].mxu1  ;;  %v788_v31 = vsel %vm371_vm2, %v768_v28, -inf }
 0x2bd   :  { %v1518_v32 = vpop.f32.mrb[19].mxu1  ;;  %789 = vmax.xlane.f32.xlu1 %v788_v31 }
 0x2be   :  { %v734_v33 = vpop.f32.mrb[20].mxu0 }
 0x2bf   :  { %v769_v34 = vsel %vm2108_vm5, -1000000.0, %v734_v33  ;;  %v1523_v35 = vpop.f32.mrb[21].mxu0 }
 0x2c0   :  { %v737_v36 = vpop.f32.mrb[22].mxu0  ;;  %v791_v37 = vsel %vm371_vm2, %v769_v34, -inf }
 0x2c1   :  { %792 = vmax.xlane.f32.xlu0 %v791_v37  ;;  %v1524_v38 = vpop.f32.mrb[23].mxu0 }
 0x2c4   :  { %v772_v39 = vpop.xlane.xlu0 %771 }
 0x2c5   :  { %v794_v40 = vsub.f32 %v748_v53, %v772_v39 }
 0x2c7   :  { %v802_v41 = vmul.f32 1.442695, %v794_v40 }
 0x2c9   :  { %1611 = vpow2.f32 %v802_v41 }
 0x2ce   :  { %359 = vrot.lane.b32.xlu1 %v2087_v45, %s1830_s5 }
 0x2d3   :  { %v2132_v42 = vpop.eup %1611 }
 0x2d4   :  { %v818_v43 = vsel %vm371_vm2, %v2132_v42, 0.0 }
 0x2f2   :  { %819 = vadd.xlane.f32.xlu1 %v818_v43 }
 0x336   :  { %v775_v46 = vpop.xlane.xlu1 %774 }
 0x337   :  { %v795_v47 = vsub.f32 %v749_v59, %v775_v46 }
 0x339   :  { %v804_v48 = vmul.f32 1.442695, %v795_v47 }
 0x33a   :  { %v778_v49 = vpop.xlane.xlu0 %777 }
 0x33b   :  { %1613 = vpow2.f32 %v804_v48  ;;  %v796_v50 = vsub.f32 %v750_v2, %v778_v49  ;;  %v2151_v2 = vpack.c.bf16 %v2085_v44, %v2085_v44 }
 0x33d   :  { %v806_v51 = vmul.f32 1.442695, %v796_v50  ;;  %v1055_v38 = vsel %vm869_vm3, %v2151_v2, 0 }
 0x33e   :  { %v781_v52 = vpop.xlane.xlu0 %780 }
 0x33f   :  { %1615 = vpow2.f32 %v806_v51  ;;  %v797_v54 = vsub.f32 %v751_v9, %v781_v52 }
 0x341   :  { %v808_v55 = vmul.f32 1.442695, %v797_v54 }
 0x342   :  { %v784_v56 = vpop.xlane.xlu1 %783 }
 0x343   :  { %1617 = vpow2.f32 %v808_v55  ;;  %v798_v4 = vsub.f32 %v2114_v16, %v784_v56 }
 0x345   :  { %v1614_v53 = vpop.eup %1613  ;;  %v810_v7 = vmul.f32 1.442695, %v798_v4 }
 0x346   :  { %v821_v57 = vsel %vm371_vm2, %v1614_v53, 0.0  ;;  %v787_v3 = vpop.xlane.xlu0 %786 }
 0x347   :  { %822 = vadd.xlane.f32.xlu0 %v821_v57  ;;  %v799_v5 = vsub.f32 %v2120_v22, %v787_v3  ;;  %1619 = vpow2.f32 %v810_v7 }
 0x349   :  { %v2137_v58 = vpop.eup %1615  ;;  %v812_v9 = vmul.f32 1.442695, %v799_v5 }
 0x34a   :  { %v790_v60 = vpop.xlane.xlu1 %789  ;;  %v824_v59 = vsel %vm371_vm2, %v2137_v58, 0.0 }
 0x34b   :  { %825 = vadd.xlane.f32.xlu1 %v824_v59  ;;  %v800_v8 = vsub.f32 %v768_v28, %v790_v60  ;;  %1621 = vpow2.f32 %v812_v9 }
 0x34d   :  { %v2141_v61 = vpop.eup %1617  ;;  %v814_v11 = vmul.f32 1.442695, %v800_v8 }
 0x34e   :  { %v360_v62 = vpop.permute.xlu1 %359  ;;  %v827_v63 = vsel %vm371_vm2, %v2141_v61, 0.0  ;;  %v793_v6 = vpop.xlane.xlu0 %792 }
 0x34f   :  { %v917_v1 = vsel %vm869_vm3, %v360_v62, 0  ;;  %828 = vadd.xlane.f32.xlu0 %v827_v63  ;;  %v801_v10 = vsub.f32 %v769_v34, %v793_v6  ;;  %1623 = vpow2.f32 %v814_v11 }
 0x350   :  { %1532 = vmatpush3.bf16.msra.mxu0 %v917_v1 }
 0x351   :  { %1543 = vmatprep.subr.bf16.mxu0 %v1828_v0  ;;  %v816_v44 = vmul.f32 1.442695, %v801_v10  ;;  %v2159_v12 = vpop.eup %1619 }
 0x352   :  { %v830_v15 = vsel %vm371_vm2, %v2159_v12, 0.0 }
 0x353   :  { %1625 = vpow2.f32 %v816_v44 }
 0x35c   :  { %367 = vrot.lane.b32.xlu1 %v2087_v45, %s1831_s16 }
 0x360   :  { %361 = vrot.lane.b32.xlu1 %v2151_v2, %s1830_s5 }
 0x365   :  { %363 = vrot.lane.b32.xlu0 %v2087_v45, %s1832_s17  ;;  %v2161_v45 = vpop.eup %1621 }
 0x366   :  { %v2163_v14 = vpop.eup %1623  ;;  %v833_v16 = vsel %vm371_vm2, %v2161_v45, 0.0 }
 0x367   :  { %v2169_v17 = vpop.eup %1625  ;;  %v836_v18 = vsel %vm371_vm2, %v2163_v14, 0.0 }
 0x368   :  { %v839_v19 = vsel %vm371_vm2, %v2169_v17, 0.0 }
 0x37f   :  { %v820_v13 = vpop.xlane.xlu1 %819 }
 0x380   :  { %1627 = vrcp.f32 %v820_v13 }
 0x384   :  { %831 = vadd.xlane.f32.xlu1 %v830_v15  ;;  %834 = vadd.xlane.f32.xlu0 %v833_v16 }
 0x388   :  { %837 = vadd.xlane.f32.xlu1 %v836_v18  ;;  %840 = vadd.xlane.f32.xlu0 %v839_v19  ;;  %v1609_v18 = vld [vmem:[#allocation13] sm:$0xff]  }
 0x38a   :  { %v1628_v20 = vpop.eup %1627 }
 0x38b   :  { %v850_v21 = vmul.f32 %v1628_v20, %v2132_v42 }
 0x38d   :  { %v858_v22 = vpack.c.bf16 %v850_v21, %v850_v21 }
 0x38f   :  { %1528 = vmatmul.mubr.msk.bf16.vlgmr.msra.gmra.mrb[20].mxu1 %vm371_vm2, %v858_v22 }
 0x390   :  { %1539 = vmatprep.mubr.msk.bf16.mxu1 %vm1829_vm0, %v1828_v0 }
 0x399   :  { %369 = vrot.lane.b32.xlu1 %v2151_v2, %s1831_s16 }
 0x39e   :  { %365 = vrot.lane.b32.xlu0 %v2151_v2, %s1832_s17 }
 0x3d4   :  { %v823_v23 = vpop.xlane.xlu0 %822 }
 0x3d5   :  { %1629 = vrcp.f32 %v823_v23 }
 0x3d8   :  { %v826_v24 = vpop.xlane.xlu1 %825 }
 0x3d9   :  { %1631 = vrcp.f32 %v826_v24 }
 0x3dc   :  { %v829_v25 = vpop.xlane.xlu0 %828  ;;  %v368_v29 = vpop.permute.xlu1 %367 }
 0x3dd   :  { %1633 = vrcp.f32 %v829_v25  ;;  %v1009_v34 = vsel %vm869_vm3, %v368_v29, 0  ;;  %v1610_v25 = vld [vmem:[#allocation13 + $0x8] sm:$0xff]  }
 0x3df   :  { %v1630_v26 = vpop.eup %1629 }
 0x3e0   :  { %v851_v27 = vmul.f32 %v1630_v26, %v1614_v53  ;;  %v364_v28 = vpop.permute.xlu0 %363  ;;  %v362_v39 = vpop.permute.xlu1 %361 }
 0x3e1   :  { %v963_v30 = vsel %vm869_vm3, %v364_v28, 0  ;;  %v1101_v41 = vsel %vm869_vm3, %v362_v39, 0 }
 0x3e2   :  { %1538 = vmatpush3.bf16.msra.mxu1 %v963_v30  ;;  %v859_v31 = vpack.c.bf16 %v851_v27, %v851_v27 }
 0x3e3   :  { %v1632_v32 = vpop.eup %1631  ;;  %1549 = vmatprep.subr.bf16.mxu1 %v1828_v0 }
 0x3e4   :  { %v852_v33 = vmul.f32 %v1632_v32, %v2137_v58  ;;  %1534 = vmatmul.mubr.msk.bf16.vlgmr.msra.gmra.mrb[24].mxu0 %vm371_vm2, %v859_v31 }
 0x3e5   :  { %1544 = vmatpush3.bf16.msra.mxu0 %v1009_v34  ;;  %1545 = vmatprep.mubr.msk.bf16.mxu0 %vm1829_vm0, %v1828_v0 }
 0x3e6   :  { %v860_v35 = vpack.c.bf16 %v852_v33, %v852_v33  ;;  %1555 = vmatprep.subr.bf16.mxu0 %v1828_v0 }
 0x3e7   :  { %v1634_v36 = vpop.eup %1633 }
 0x3e8   :  { %v853_v37 = vmul.f32 %v1634_v36, %v2141_v61  ;;  %1540 = vmatmul.mubr.msk.bf16.vlgmr.msra.gmra.mrb[24].mxu1 %vm371_vm2, %v860_v35 }
 0x3e9   :  { %1550 = vmatpush3.bf16.msra.mxu1 %v1055_v38  ;;  %1551 = vmatprep.mubr.msk.bf16.mxu1 %vm1829_vm0, %v1828_v0 }
 0x3ea   :  { %v861_v40 = vpack.c.bf16 %v853_v37, %v853_v37  ;;  %1561 = vmatprep.subr.bf16.mxu1 %v1828_v0 }
 0x3ec   :  { %1546 = vmatmul.mubr.msk.bf16.vlgmr.msra.gmra.mrb[28].mxu0 %vm371_vm2, %v861_v40 }
 0x3ed   :  { %1556 = vmatpush3.bf16.msra.mxu0 %v1101_v41  ;;  %1557 = vmatprep.mubr.msk.bf16.mxu0 %vm1829_vm0, %v1828_v0 }
 0x3ee   :  { %1567 = vmatprep.subr.bf16.mxu0 %v1828_v0 }
 0x411   :  { %v832_v42 = vpop.xlane.xlu1 %831  ;;  %v835_v43 = vpop.xlane.xlu0 %834 }
 0x412   :  { %1635 = vrcp.f32 %v832_v42 }
 0x413   :  { %1637 = vrcp.f32 %v835_v43 }
 0x415   :  { %v838_v46 = vpop.xlane.xlu1 %837  ;;  %v841_v47 = vpop.xlane.xlu0 %840 }
 0x416   :  { %1639 = vrcp.f32 %v838_v46 }
 0x417   :  { %1641 = vrcp.f32 %v841_v47 }
 0x419   :  { %v366_v52 = vpop.permute.xlu0 %365  ;;  %v370_v54 = vpop.permute.xlu1 %369 }
 0x41a   :  { %v1147_v58 = vsel %vm869_vm3, %v366_v52, 0  ;;  %v1193_v60 = vsel %vm869_vm3, %v370_v54, 0 }
 0x41c   :  { %v1636_v48 = vpop.eup %1635 }
 0x41d   :  { %v1638_v49 = vpop.eup %1637  ;;  %v854_v50 = vmul.f32 %v1636_v48, %v2159_v12 }
 0x41e   :  { %v855_v51 = vmul.f32 %v1638_v49, %v2161_v45 }
 0x41f   :  { %v862_v55 = vpack.c.bf16 %v854_v50, %v854_v50 }
 0x420   :  { %v1640_v53 = vpop.eup %1639  ;;  %v863_v56 = vpack.c.bf16 %v855_v51, %v855_v51 }
 0x421   :  { %v1642_v57 = vpop.eup %1641  ;;  %1552 = vmatmul.mubr.msk.bf16.vlgmr.msra.gmra.mrb[28].mxu1 %vm371_vm2, %v862_v55  ;;  %v856_v59 = vmul.f32 %v1640_v53, %v2163_v14 }
 0x422   :  { %1558 = vmatmul.mubr.msk.bf16.vlgmr.msra.gmra.mrb[32].mxu0 %vm371_vm2, %v863_v56  ;;  %1562 = vmatpush3.bf16.msra.mxu1 %v1147_v58  ;;  %v857_v61 = vmul.f32 %v1642_v57, %v2169_v17 }
 0x423   :  { %1568 = vmatpush3.bf16.msra.mxu0 %v1193_v60  ;;  %1563 = vmatprep.mubr.msk.bf16.mxu1 %vm1829_vm0, %v1828_v0  ;;  %v864_v62 = vpack.c.bf16 %v856_v59, %v856_v59 }
 0x424   :  { %1569 = vmatprep.mubr.msk.bf16.mxu0 %vm1829_vm0, %v1828_v0  ;;  %1573 = vmatprep.subr.bf16.mxu1 %v1828_v0  ;;  %v865_v63 = vpack.c.bf16 %v857_v61, %v857_v61 }
 0x429   :  { %1564 = vmatmul.mubr.msk.bf16.vlgmr.msra.gmra.mrb[32].mxu1 %vm371_vm2, %v864_v62 }
 0x42a   :  { %1570 = vmatmul.mubr.msk.bf16.vlgmr.msra.gmra.mrb[36].mxu0 %vm371_vm2, %v865_v63  ;;  %1577 = vmatprep.mubr.msk.bf16.mxu1 %vm1829_vm0, %v1828_v0 }
 0x42b   :  { %1574 = vmatpush3.bf16.msra.mxu1 %v1609_v18 }
 0x42c   :  { %1575 = vmatprep.subr.bf16.mxu1 %v1828_v0 }
 0x42f   :  { %1576 = vmatpush3.bf16.msra.mxu1 %v1610_v25 }
 0x462   :  { %v2220_v1 = vpop.f32.mrb[20].mxu1 }
 0x463   :  { %v1529_v2 = vpop.f32.mrb[21].mxu1  ;;  %v1235_v42 = vpack.c.bf16 %v2220_v1, %v2220_v1 }
 0x464   :  { %v910_v3 = vpop.f32.mrb[22].mxu1 }
 0x465   :  { %v1530_v4 = vpop.f32.mrb[23].mxu1 }
 0x4b7   :  { %v953_v5 = vpop.f32.mrb[24].mxu0 }
 0x4b8   :  { %v1236_v6 = vpack.c.bf16 %v953_v5, %v953_v5  ;;  %v1535_v7 = vpop.f32.mrb[25].mxu0 }
 0x4b9   :  { %v956_v8 = vpop.f32.mrb[26].mxu0 }
 0x4ba   :  { %1245 = vrot.lane.b32.xlu0 %v1236_v6, %s1833_s0  ;;  %v1536_v9 = vpop.f32.mrb[27].mxu0 }
 0x4bb   :  { %v999_v10 = vpop.f32.mrb[24].mxu1 }
 0x4bc   :  { %v1237_v11 = vpack.c.bf16 %v999_v10, %v999_v10  ;;  %v1541_v44 = vpop.f32.mrb[25].mxu1 }
 0x4bd   :  { %v1002_v12 = vpop.f32.mrb[26].mxu1 }
 0x4be   :  { %v1542_v13 = vpop.f32.mrb[27].mxu1  ;;  %1251 = vrot.lane.b32.xlu0 %v1237_v11, %s1834_s22 }
 0x4bf   :  { %v1045_v45 = vpop.f32.mrb[28].mxu0 }
 0x4c0   :  { %v1238_v14 = vpack.c.bf16 %v1045_v45, %v1045_v45  ;;  %v1547_v15 = vpop.f32.mrb[29].mxu0 }
 0x4c1   :  { %v1048_v16 = vpop.f32.mrb[30].mxu0 }
 0x4c2   :  { %1257 = vrot.lane.b32.xlu0 %v1238_v14, %s1835_s23  ;;  %v1548_v17 = vpop.f32.mrb[31].mxu0 }
 0x4f4   :  { %v1091_v19 = vpop.f32.mrb[28].mxu1 }
 0x4f5   :  { %v1137_v20 = vpop.f32.mrb[32].mxu0  ;;  %v1553_v21 = vpop.f32.mrb[29].mxu1  ;;  %v1239_v43 = vpack.c.bf16 %v1091_v19, %v1091_v19 }
 0x4f6   :  { %v1240_v22 = vpack.c.bf16 %v1137_v20, %v1137_v20  ;;  %v1559_v23 = vpop.f32.mrb[33].mxu0  ;;  %v1094_v24 = vpop.f32.mrb[30].mxu1 }
 0x4f7   :  { %v1140_v26 = vpop.f32.mrb[34].mxu0  ;;  %v1554_v27 = vpop.f32.mrb[31].mxu1 }
 0x4f8   :  { %1247 = vrot.lane.b32.xlu1 %v1240_v22, %s1833_s0  ;;  %v1560_v28 = vpop.f32.mrb[35].mxu0 }
 0x4fc   :  { %v1183_v29 = vpop.f32.mrb[32].mxu1 }
 0x4fd   :  { %v1241_v30 = vpack.c.bf16 %v1183_v29, %v1183_v29  ;;  %v1229_v31 = vpop.f32.mrb[36].mxu0  ;;  %v1565_v32 = vpop.f32.mrb[33].mxu1 }
 0x4fe   :  { %v1571_v33 = vpop.f32.mrb[37].mxu0  ;;  %v1186_v34 = vpop.f32.mrb[34].mxu1  ;;  %v1242_v37 = vpack.c.bf16 %v1229_v31, %v1229_v31 }
 0x4ff   :  { %v1232_v35 = vpop.f32.mrb[38].mxu0  ;;  %v1566_v36 = vpop.f32.mrb[35].mxu1  ;;  %1253 = vrot.lane.b32.xlu1 %v1241_v30, %s1834_s22 }
 0x500   :  { %v1572_v0 = vpop.f32.mrb[39].mxu0 }
 0x503   :  { %1259 = vrot.lane.b32.xlu1 %v1242_v37, %s1835_s23 }
 0x52c   :  { %v1246_v38 = vpop.permute.xlu0 %1245 }
 0x52d   :  { %v1263_v47 = vsel %vm371_vm2, %v1235_v42, %v1246_v38 }
 0x530   :  { %v1252_v39 = vpop.permute.xlu0 %1251 }
 0x531   :  { %v1269_v49 = vsel %vm1267_vm6, %v1263_v47, %v1252_v39 }
 0x534   :  { %v1258_v46 = vpop.permute.xlu0 %1257 }
 0x535   :  { %v1274_v52 = vsel %vm1272_vm7, %v1269_v49, %v1258_v46 }
 0x56a   :  { %v1248_v40 = vpop.permute.xlu1 %1247 }
 0x56b   :  { %v1266_v48 = vsel %vm371_vm2, %v1239_v43, %v1248_v40 }
 0x571   :  { %v1254_v41 = vpop.permute.xlu1 %1253 }
 0x572   :  { %v1271_v50 = vsel %vm1267_vm6, %v1266_v48, %v1254_v41 }
 0x575   :  { %v1260_v51 = vpop.permute.xlu1 %1259 }
 0x576   :  { %v1276_v54 = vsel %vm1272_vm7, %v1271_v50, %v1260_v51 }
 0x577   :  { %v1399_v55 = vcombine.low %v1274_v52, %v1276_v54 }
 0x579   :  { %1578 = vmatmul.mubr.msk.bf16.vlgmr.msra.gmra.mrb[36].mxu1 %vm142_vm1, %v1399_v55 }
 0x64c   :  { %v1335_v53 = vpop.f32.mrb[36].mxu1 }
 0x64d   :  { %1342 = vst [vmem:[#allocation15] sm:$0xff] %v1335_v53  ;;  %v1579_v56 = vpop.f32.mrb[37].mxu1 }
 0x64e   :  { %v1338_v57 = vpop.f32.mrb[38].mxu1 }
 0x64f   :  { %1343 = vst [vmem:[#allocation15 + $0x8] sm:$0xff] %v1338_v57  ;;  %v1580_v58 = vpop.f32.mrb[39].mxu1 }
 0x650   :  { %1796 = shalt.err (!%p1793_p13)
}
 0x651   :  { %s1797_s3 = scalar_lea.hbm %s2253_s8, 256 }
 0x652   :  { %p1798_p0 = scmp.ne.s32.totalorder %s2253_s8, %s1797_s3  ;;  %p1801_p1 = scmp.lt.u32.totalorder %s1797_s3, %s2253_s8 }
 0x654   :  { %p1803_p2 = pnand %p1801_p1, %p1798_p0 }
 0x656   :  { %1806 = shalt.err (!%p1803_p2)
}
 0x657   :  { %s1837_s10 = smov 128  }
 0x658   :  { %1355 = dma.vmem_to_hbm [thread:$0]  %s1350_s25, 256, %s2253_s8, [#allocation6], %s1837_s10, %s1837_s10, %s1833_s0  }
 0x659   :  { %1817 = dma.done.wait [#allocation6], 256  }
 0x65a   :  { %1818 = vsyncadd [#allocation6], 4294967040 }
 0x65b   :  { %1359 = vsyncpa [#allocation5], 1 }
 0x65c   :  { %1360 = vsyncpa [#allocation8], 1 }
 0x65d   :  { %1361 = vsyncpa [#allocation11], 1 }
 0x65e   :  { %1362 = vsyncpa [#allocation14], 1 }
 0x65f   :  { %1363 = vsyncpa [#allocation6], 1 }

</bundles_post_ra>
